<compile_context>
chip_gen: v7x
topology: tpu7x:2x2x1
jax: 0.10.0
libtpu: 0.0.40
codegen_flags: <defaults>
</compile_context>

<pallas_src>
import functools
import math

import jax
import jax.numpy as jnp
from jax.experimental import pallas as pl
from jax.experimental.pallas import tpu as pltpu

N_EMBD = 64
BLOCK_SIZE = 256  # causal buffer is tril(block_size, block_size); only the first T rows/cols are used


def _pick_block_b(B: int, T: int, C: int, H: int, itemsize: int) -> int:
    """Pick the per-step batch block.

    Constraints / goals:
      * bb divides B and (bb == B or bb % 8 == 0) so the lane-dense (B, T*H) output block and
        the (bb*T, C) x block keep (8,128)-friendly sublane dims.
      * bb <= 16 (VMEM sweet spot; v7x has half the VMEM of v6e).
      * double-buffered x block + live f32 softmax intermediates stay well under v5e's 16 MiB
        default scoped VMEM.
      * tiny working sets -> one big step (avoid ~0.35us/step grid overhead on single-TC parts);
        large working sets -> >= 4 steps so both v7x TensorCores get per-core pipelining.
    """
    def vmem_ok(bb: int) -> bool:
        x_blk = 2 * bb * T * C * itemsize        # double-buffered input block
        soft = 3 * bb * T * T * 4                # live f32 scores / exp / p copies
        out_blk = 2 * bb * T * H * 4             # double-buffered output block (upper bound)
        return x_blk + soft + out_blk <= 10 * 1024 * 1024

    valid = [d for d in range(1, B + 1)
             if B % d == 0 and d <= 16 and (d == B or d % 8 == 0)]
    if not valid:                                # e.g. B = 20: fall back to one step over all of B
        return B
    fitting = [d for d in valid if vmem_ok(d)] or [min(valid)]

    tiny = B * T * C * itemsize <= 256 * 1024
    if tiny:
        return max(fitting)                      # fewest steps wins when DMA is only tens of KiB
    multi = [d for d in fitting if B // d >= 4]  # >= 2 steps per v7x TensorCore
    return max(multi) if multi else max(fitting)


def _head_kernel(mask_ref, x_ref, w_ref, b_ref, o_ref, *, matmul_dtype, approx_recip, precision):
    # mask_ref: (T, T) f32 additive causal mask (0 on/below diag, -1e30 above)
    # x_ref:    (bb*T, C) in matmul_dtype
    # w_ref:    (C, 3H) fused [k | q*scale | v] weights in matmul_dtype
    # b_ref:    (1, 3H) fused f32 biases (q bias pre-scaled)
    # o_ref:    (bb, T*H) lane-dense output block
    t = mask_ref.shape[0]
    bb = o_ref.shape[0]
    h = w_ref.shape[1] // 3

    # One fused projection: (bb*T, C) @ (C, 3H) -> f32 accumulate, f32 bias add.
    kqv = jnp.dot(x_ref[...], w_ref[...],
                  preferred_element_type=jnp.float32, precision=precision) + b_ref[...]

    # Lane slices at 0/H/2H stay within one 128-lane tile (3H = 48).
    k = kqv[:, :h].reshape(bb, t, h)
    q = kqv[:, h:2 * h].reshape(bb, t, h)   # 1/sqrt(H) already folded into the q weight/bias
    v = kqv[:, 2 * h:].reshape(bb, t, h)

    # Q @ K^T as a batched last-axis contraction (flash-attention pattern, no explicit k.T).
    s = jnp.einsum("bqh,bkh->bqk", q.astype(matmul_dtype), k.astype(matmul_dtype),
                   preferred_element_type=jnp.float32)                      # (bb, T, T) f32
    s = s + mask_ref[...]

    # Softmax in f32. Diagonal always unmasked -> finite row max -> no NaNs.
    s = s - s.max(axis=-1, keepdims=True)
    p = jnp.exp(s)
    inv = pl.reciprocal(p.sum(axis=-1, keepdims=True), approx=approx_recip)  # EUP, not a VALU divide
    # Cast p before the PV matmul so the big f32 scores/p copies can die early (v7x VMEM headroom).
    p = (p * inv).astype(matmul_dtype)

    out = jnp.einsum("bqk,bkh->bqh", p, v.astype(matmul_dtype),
                     preferred_element_type=jnp.float32)                     # (bb, T, H) f32

    # Lane-dense store: flatten (bb, T, H) -> (bb, T*H); wrapper reshapes back to (B, T, H).
    o_ref[...] = out.reshape(bb, t * h).astype(o_ref.dtype)


def head_forward(x, wk, wq, wv, bk, bq, bv, *, matmul_dtype=jnp.bfloat16):
    """x: (B, T, C); w*: (C, H) (pre-transposed nn.Linear weights); b*: (H,). Returns (B, T, H)."""
    B, T, C = x.shape
    H = wk.shape[1]
    assert C == N_EMBD and T <= BLOCK_SIZE

    out_dtype = x.dtype
    scale = 1.0 / math.sqrt(H)  # Key.size(-1) ** 0.5

    matmul_dtype = jnp.dtype(matmul_dtype)
    f32_path = matmul_dtype == jnp.dtype(jnp.float32)
    # Exact-f32 projection on the f32 path; approx (EUP vrcp) reciprocal only on the bf16 path.
    precision = jax.lax.Precision.HIGHEST if f32_path else None
    approx_recip = not f32_path

    itemsize = matmul_dtype.itemsize
    block_b = _pick_block_b(B, T, C, H, itemsize)
    grid_b = B // block_b

    # Additive causal mask, built once outside the kernel and held resident across grid steps.
    row = jax.lax.broadcasted_iota(jnp.int32, (T, T), 0)
    col = jax.lax.broadcasted_iota(jnp.int32, (T, T), 1)
    mask = jnp.where(col <= row, 0.0, -1e30).astype(jnp.float32)

    # Fused QKV weights/biases; 1/sqrt(H) folded into the q columns (power-of-two for H=16 -> exact).
    w_qkv = jnp.concatenate([wk, wq * scale, wv], axis=1).astype(matmul_dtype)      # (C, 3H)
    b_qkv = jnp.concatenate([bk, bq * scale, bv]).reshape(1, 3 * H).astype(jnp.float32)

    # Flatten x in the wrapper (free layout plumbing) so the kernel block is 2D and (8,128)-aligned.
    x2 = x.reshape(B * T, C).astype(matmul_dtype)

    kernel = functools.partial(_head_kernel, matmul_dtype=matmul_dtype,
                               approx_recip=approx_recip, precision=precision)

    out_itemsize = jnp.dtype(out_dtype).itemsize
    cost = pl.CostEstimate(
        flops=int(2 * B * T * (3 * H * C + 2 * T * H)),       # fused projection + QK^T + PV
        transcendentals=int(B * T * T),                       # exp in softmax
        bytes_accessed=int(itemsize * (B * T * C + C * 3 * H)
                           + 4 * (3 * H + T * T)
                           + out_itemsize * B * T * H),
    )

    out = pl.pallas_call(
        kernel,
        out_shape=jax.ShapeDtypeStruct((B, T * H), out_dtype),
        grid_spec=pltpu.PrefetchScalarGridSpec(
            num_scalar_prefetch=0,
            grid=(grid_b,),
            in_specs=[
                pl.BlockSpec((T, T), lambda b: (0, 0)),                # causal mask (resident)
                pl.BlockSpec((block_b * T, C), lambda b: (b, 0)),       # x rows for this batch block
                pl.BlockSpec((C, 3 * H), lambda b: (0, 0)),             # fused QKV weight (resident)
                pl.BlockSpec((1, 3 * H), lambda b: (0, 0)),             # fused QKV bias (resident)
            ],
            out_specs=pl.BlockSpec((block_b, T * H), lambda b: (b, 0)),  # lane-dense output
        ),
        compiler_params=pltpu.CompilerParams(dimension_semantics=("parallel",)),
        cost_estimate=cost,
    )(mask, x2, w_qkv, b_qkv)

    return out.reshape(B, T, H)


def head_reference(x, wk, wq, wv, bk, bq, bv):
    """Pure-JAX reference mirroring the PyTorch forward (f32)."""
    k = x @ wk + bk
    q = x @ wq + bq
    v = x @ wv + bv
    H = wk.shape[1]
    aff = jnp.einsum("btd,bsd->bts", q, k) / math.sqrt(H)
    T = x.shape[1]
    mask = jnp.tril(jnp.ones((T, T), dtype=bool))
    aff = jnp.where(mask, aff, -jnp.inf)
    p = jax.nn.softmax(aff, axis=-1)
    return p @ v


if __name__ == "__main__":
    key = jax.random.PRNGKey(0)
    B, T, C, H = 8, 16, N_EMBD, 16  # head_size = 16; tiny working set -> block_b = 8, grid = 1

    kx, kwk, kwq, kwv, kbk, kbq, kbv = jax.random.split(key, 7)
    x = jax.random.normal(kx, (B, T, C), dtype=jnp.float32)

    # nn.Linear(n_embd, head_size): weight (H, C), y = x @ W^T + b.
    # Weights are stored pre-transposed as (C, H) for the kernel.
    bound = 1.0 / math.sqrt(C)
    wk = jax.random.uniform(kwk, (C, H), minval=-bound, maxval=bound, dtype=jnp.float32)
    wq = jax.random.uniform(kwq, (C, H), minval=-bound, maxval=bound, dtype=jnp.float32)
    wv = jax.random.uniform(kwv, (C, H), minval=-bound, maxval=bound, dtype=jnp.float32)
    bk = jax.random.uniform(kbk, (H,), minval=-bound, maxval=bound, dtype=jnp.float32)
    bq = jax.random.uniform(kbq, (H,), minval=-bound, maxval=bound, dtype=jnp.float32)
    bv = jax.random.uniform(kbv, (H,), minval=-bound, maxval=bound, dtype=jnp.float32)

    ref = head_reference(x, wk, wq, wv, bk, bq, bv)

    # Default path: bf16 MXU operands, f32 accumulation / f32 softmax (looser tolerance).
    out = head_forward(x, wk, wq, wv, bk, bq, bv)
    jax.block_until_ready(out)
    assert out.shape == (B, T, H)
    assert jnp.allclose(out, ref, atol=5e-2, rtol=5e-2), "bf16 kernel mismatch vs reference"

    # Exact f32 path (HIGHEST-precision projection, exact reciprocal) for PyTorch-like semantics.
    out_f32 = head_forward(x, wk, wq, wv, bk, bq, bv, matmul_dtype=jnp.float32)
    jax.block_until_ready(out_f32)
    assert out_f32.shape == (B, T, H)
    assert jnp.allclose(out_f32, ref, atol=1e-5, rtol=1e-5), "f32 kernel mismatch vs reference"

    print("KERNEL_OK")
</pallas_src>

<mosaic_0001>
module attributes {stable_mosaic.version = 11 : i64} {
  func.func @_head_kernel(%arg0: i32, %arg1: memref<16x16xf32, #tpu.memory_space<vmem>>, %arg2: memref<128x64xbf16, #tpu.memory_space<vmem>>, %arg3: memref<64x48xbf16, #tpu.memory_space<vmem>>, %arg4: memref<1x48xf32, #tpu.memory_space<vmem>>, %arg5: memref<8x256xf32, #tpu.memory_space<vmem>>) attributes {dimension_semantics = [#tpu.dimension_semantics<parallel>], iteration_bounds = array<i64: 1>, scalar_prefetch = 0 : i64, scratch_operands = 0 : i64, tpu.core_type = #tpu.core_type<tc>, window_params = [{pipeline_mode = #tpu.pipeline_mode<synchronous>, transform_indices = @transform_0, window_bounds = array<i64: 16, 16>}, {transform_indices = @transform_1, window_bounds = array<i64: 128, 64>}, {pipeline_mode = #tpu.pipeline_mode<synchronous>, transform_indices = @transform_2, window_bounds = array<i64: 64, 48>}, {pipeline_mode = #tpu.pipeline_mode<synchronous>, transform_indices = @transform_3, window_bounds = array<i64: 1, 48>}, {transform_indices = @transform_4, window_bounds = array<i64: 8, 256>}]} {
    %c0 = arith.constant 0 : index
    %c0_0 = arith.constant 0 : index
    %0 = vector.load %arg2[%c0, %c0_0] : memref<128x64xbf16, #tpu.memory_space<vmem>>, vector<128x64xbf16>
    %c0_1 = arith.constant 0 : index
    %c0_2 = arith.constant 0 : index
    %1 = vector.load %arg3[%c0_1, %c0_2] : memref<64x48xbf16, #tpu.memory_space<vmem>>, vector<64x48xbf16>
    %cst = arith.constant dense<0.000000e+00> : vector<128x48xf32>
    %2 = tpu.matmul %0, %1, %cst {dimension_numbers = #tpu.dot_dimension_numbers<[1], [0], [0], [1], [0, 0, 1, 1], [], []>} : vector<128x64xbf16>, vector<64x48xbf16>, vector<128x48xf32> -> vector<128x48xf32>
    %c0_3 = arith.constant 0 : index
    %c0_4 = arith.constant 0 : index
    %3 = vector.load %arg4[%c0_3, %c0_4] : memref<1x48xf32, #tpu.memory_space<vmem>>, vector<1x48xf32>
    %4 = vector.broadcast %3 : vector<1x48xf32> to vector<128x48xf32>
    %5 = arith.addf %2, %4 : vector<128x48xf32>
    %6 = vector.extract_strided_slice %5 {offsets = [0, 0], sizes = [128, 16], strides = [1, 1]} : vector<128x48xf32> to vector<128x16xf32>
    %7 = vector.shape_cast %6 : vector<128x16xf32> to vector<8x16x16xf32>
    %8 = vector.extract_strided_slice %5 {offsets = [0, 16], sizes = [128, 16], strides = [1, 1]} : vector<128x48xf32> to vector<128x16xf32>
    %9 = vector.shape_cast %8 : vector<128x16xf32> to vector<8x16x16xf32>
    %10 = vector.extract_strided_slice %5 {offsets = [0, 32], sizes = [128, 16], strides = [1, 1]} : vector<128x48xf32> to vector<128x16xf32>
    %11 = vector.shape_cast %10 : vector<128x16xf32> to vector<8x16x16xf32>
    %12 = arith.truncf %9 : vector<8x16x16xf32> to vector<8x16x16xbf16>
    %13 = arith.truncf %7 : vector<8x16x16xf32> to vector<8x16x16xbf16>
    "tpu.trace_start"() <{level = 10 : i32, message = "bqh,bkh->bqk"}> : () -> ()
    %cst_5 = arith.constant dense<0.000000e+00> : vector<8x16x16xf32>
    %14 = tpu.matmul %12, %13, %cst_5 {dimension_numbers = #tpu.dot_dimension_numbers<[2], [2], [1], [1], [0, 0, 0, 1, 1, 1], [0], [0]>} : vector<8x16x16xbf16>, vector<8x16x16xbf16>, vector<8x16x16xf32> -> vector<8x16x16xf32>
    "tpu.trace_stop"() : () -> ()
    %c0_6 = arith.constant 0 : index
    %c0_7 = arith.constant 0 : index
    %15 = vector.load %arg1[%c0_6, %c0_7] : memref<16x16xf32, #tpu.memory_space<vmem>>, vector<16x16xf32>
    %16 = vector.shape_cast %15 : vector<16x16xf32> to vector<1x16x16xf32>
    %17 = vector.broadcast %16 : vector<1x16x16xf32> to vector<8x16x16xf32>
    %18 = arith.addf %14, %17 : vector<8x16x16xf32>
    %cst_8 = arith.constant dense<0xFF800000> : vector<8x16xf32>
    %19 = vector.multi_reduction <maximumf>, %18, %cst_8 [2] : vector<8x16x16xf32> to vector<8x16xf32>
    %20 = vector.shape_cast %19 : vector<8x16xf32> to vector<8x16x1xf32>
    %21 = vector.broadcast %20 : vector<8x16x1xf32> to vector<8x16x16xf32>
    %22 = arith.subf %18, %21 : vector<8x16x16xf32>
    %23 = math.exp %22 : vector<8x16x16xf32>
    %cst_9 = arith.constant dense<0.000000e+00> : vector<8x16xf32>
    %24 = vector.multi_reduction <add>, %23, %cst_9 [2] : vector<8x16x16xf32> to vector<8x16xf32>
    %25 = vector.shape_cast %24 : vector<8x16xf32> to vector<8x16x1xf32>
    %26 = tpu.reciprocal %25 {approx = true} : vector<8x16x1xf32> -> vector<8x16x1xf32>
    %27 = vector.broadcast %26 : vector<8x16x1xf32> to vector<8x16x16xf32>
    %28 = arith.mulf %23, %27 : vector<8x16x16xf32>
    %29 = arith.truncf %28 : vector<8x16x16xf32> to vector<8x16x16xbf16>
    %30 = arith.truncf %11 : vector<8x16x16xf32> to vector<8x16x16xbf16>
    "tpu.trace_start"() <{level = 10 : i32, message = "bqk,bkh->bqh"}> : () -> ()
    %cst_10 = arith.constant dense<0.000000e+00> : vector<8x16x16xf32>
    %31 = tpu.matmul %29, %30, %cst_10 {dimension_numbers = #tpu.dot_dimension_numbers<[2], [1], [1], [2], [0, 0, 0, 1, 1, 2], [0], [0]>} : vector<8x16x16xbf16>, vector<8x16x16xbf16>, vector<8x16x16xf32> -> vector<8x16x16xf32>
    "tpu.trace_stop"() : () -> ()
    %32 = vector.shape_cast %31 : vector<8x16x16xf32> to vector<8x256xf32>
    %c0_11 = arith.constant 0 : index
    %c0_12 = arith.constant 0 : index
    %33 = vector.load %arg5[%c0_11, %c0_12] : memref<8x256xf32, #tpu.memory_space<vmem>>, vector<8x256xf32>
    tpu.vector_store %arg5[%c0_11, %c0_12], %32 {strides = array<i32>} : memref<8x256xf32, #tpu.memory_space<vmem>>, vector<8x256xf32>,
    return
  }
  func.func @transform_0(%arg0: i32) -> (i32, i32) {
    %c0_i32 = arith.constant 0 : i32
    %c0_i32_0 = arith.constant 0 : i32
    %c0_i32_1 = arith.constant 0 : i32
    return %c0_i32, %c0_i32_0 : i32, i32
  }
  func.func @transform_1(%arg0: i32) -> (i32, i32) {
    %c0_i32 = arith.constant 0 : i32
    %c0_i32_0 = arith.constant 0 : i32
    return %arg0, %c0_i32 : i32, i32
  }
  func.func @transform_2(%arg0: i32) -> (i32, i32) {
    %c0_i32 = arith.constant 0 : i32
    %c0_i32_0 = arith.constant 0 : i32
    %c0_i32_1 = arith.constant 0 : i32
    return %c0_i32, %c0_i32_0 : i32, i32
  }
  func.func @transform_3(%arg0: i32) -> (i32, i32) {
    %c0_i32 = arith.constant 0 : i32
    %c0_i32_0 = arith.constant 0 : i32
    %c0_i32_1 = arith.constant 0 : i32
    return %c0_i32, %c0_i32_0 : i32, i32
  }
  func.func @transform_4(%arg0: i32) -> (i32, i32) {
    %c0_i32 = arith.constant 0 : i32
    %c0_i32_0 = arith.constant 0 : i32
    return %arg0, %c0_i32 : i32, i32
  }
}

</mosaic_0001>

<bundles_post_ra>
// kernel: tpu_custom_call.1
= control target key start
LH: loop header
LB: loop body
LE: loop exit
PB: predicated region body
PF: predicated region fallthrough
CT: control target
= control target key end

     0   :  { %vm114_vm0 = vcmask 523264   ;;  %s2332_s0 = inlined_call_operand.vmem [shape: f32[16,16], index: 0, kind: input, shape index: {}]   ;;  %s2333_s1 = inlined_call_operand.vmem [shape: bf16[128,64], index: 1, kind: input, shape index: {}]   ;;  %s2334_s2 = inlined_call_operand.vmem [shape: bf16[64,48], index: 2, kind: input, shape index: {}]   ;;  %s2335_s3 = inlined_call_operand.vmem [shape: f32[1,48], index: 3, kind: input, shape index: {}]   ;;  %s2336_s4 = inlined_call_operand.hbm [shape: f32[8,256], index: 4, kind: output, shape index: {}]  }
   0x1   :  { %v1783_v0 = vld [vmem:[%s2334_s2] sm:$0xff]   ;;  %v1784_v1 = vld [vmem:[%s2334_s2 + $0x8] sm:$0xff]   ;;  %v1785_v2 = vld [vmem:[%s2334_s2 + $0x10] sm:$0xff]  }
   0x2   :  { %1651 = vmatprep.subr.bf16.mxu0 %v1783_v0  ;;  %v1787_v3 = vld [vmem:[%s2333_s1] sm:$0xff]   ;;  %v1786_v4 = vld [vmem:[%s2334_s2 + $0x18] sm:$0xff]  }
   0x3   :  { %1652 = vmatpush3.bf16.msra.mxu0 %v1783_v0  ;;  %1659 = vmatprep.mubr.msk.bf16.mxu0 %vm114_vm0, %v1787_v3 }
   0x4   :  { %1653 = vmatprep.subr.bf16.mxu0 %v1784_v1 }
   0x7   :  { %1654 = vmatpush3.bf16.msra.mxu0 %v1784_v1 }
   0x8   :  { %1655 = vmatprep.subr.bf16.mxu0 %v1785_v2 }
   0xb   :  { %1656 = vmatpush3.bf16.msra.mxu0 %v1785_v2 }
   0xc   :  { %1657 = vmatprep.subr.bf16.mxu0 %v1786_v4 }
   0xd   :  { %9 = vsyncpa [#allocation3], 0  ;;  %v1788_v5 = vld [vmem:[%s2333_s1 + $0x8] sm:$0xff]   ;;  %v1789_v6 = vld [vmem:[%s2333_s1 + $0x10] sm:$0xff]   ;;  %v1883_v12 = vmov 0.0   ;;  %vm1884_vm1 = vmmov 0  }
   0xe   :  { %v1790_v7 = vld [vmem:[%s2333_s1 + $0x18] sm:$0xff]   ;;  %v1791_v8 = vld [vmem:[%s2333_s1 + $0x20] sm:$0xff]   ;;  %v1792_v9 = vld [vmem:[%s2333_s1 + $0x28] sm:$0xff]   ;;  %1675 = vmatprep.subr.bf16.mxu1 %v1883_v12  ;;  %1677 = vmatprep.mubr.msk.bf16.mxu1 %vm1884_vm1, %v1883_v12  ;;  %vm249_vm2 = vcmask 130048   ;;  %s1890_s18 = smov 32   ;;  %s1891_s19 = smov 48  }
   0xf   :  { %1658 = vmatpush3.bf16.msra.mxu0 %v1786_v4  ;;  %v1793_v10 = vld [vmem:[%s2333_s1 + $0x30] sm:$0xff]   ;;  %v1794_v11 = vld [vmem:[%s2333_s1 + $0x38] sm:$0xff]   ;;  %v1570_v14 = vld [vmem:[%s2335_s3] ss:$0 sm:$0xff]  ;;  %s1885_s1 = smov 112   ;;  %s1886_s3 = smov 96  }
  0x10   :  { %1705 = vmatprep.subr.bf16.mxu0 %v1883_v12  ;;  %s1892_s20 = smov 64   ;;  %s1893_s21 = smov 80   ;;  %vm1536_vm3 = vcmask 261120   ;;  %vm1538_vm4 = vcmask 392192   ;;  %vm1541_vm5 = vcmask 654336   ;;  %vm1543_vm6 = vcmask 785408  }
  0x11   :  { %vm1545_vm7 = vcmask 916480   ;;  %s1894_s22 = smov [#allocation2]  }
  0x12   :  { %1660 = vmatmul.mubr.msk.bf16.vlgmr.msra.gmra.mrb[0].mxu0 %vm114_vm0, %v1788_v5  ;;  %s1562_s23 = sshll.u32 %s1894_s22, 4  ;;  %s1563_s23 = int_to_ptr.vmem [resolvable:$true] %s1562_s23 }
  0x13   :  { %1663 = vmatprep.mubr.msk.bf16.mxu0 %vm114_vm0, %v1789_v6  ;;  %s1859_s24 = scalar_lea.vmem %s1563_s23, 256  ;;  %p1864_p1 = scmp.lt.s32.totalorder %s1563_s23, %s1563_s23 }
  0x14   :  { %p1860_p0 = scmp.ne.s32.totalorder %s1563_s23, %s1859_s24  ;;  %p1865_p2 = scmp.lt.s32.totalorder %s1859_s24, %s1859_s24 }
  0x16   :  { %p1866_p3 = por %p1865_p2, %p1864_p1 }
  0x18   :  { %p1867_p4 = pnand %p1866_p3, %p1860_p0 }
  0x1a   :  { %1664 = vmatmul.mubr.msk.bf16.gmra.mrb[4].mxu0 %vm114_vm0, %v1790_v7  ;;  %v2054_v7 = vld [vmem:[%s2332_s0] sm:$0xff] }
  0x1b   :  { %1667 = vmatprep.mubr.msk.bf16.mxu0 %vm114_vm0, %v1791_v8 }
  0x22   :  { %1668 = vmatmul.mubr.msk.bf16.gmra.mrb[8].mxu0 %vm114_vm0, %v1792_v9  ;;  %v2059_v9 = vld [vmem:[%s2332_s0 + $0x8] sm:$0xff]  ;;  %s1889_s0 = smov 16  }
  0x23   :  { %1671 = vmatprep.mubr.msk.bf16.mxu0 %vm114_vm0, %v1793_v10 }
  0x2a   :  { %1672 = vmatmul.mubr.msk.bf16.gmra.mrb[12].mxu0 %vm114_vm0, %v1794_v11 }
  0x2b   :  { %1707 = vmatprep.mubr.msk.bf16.mxu0 %vm1884_vm1, %v1883_v12 }
  0xe5   :  { %v1661_v13 = vpop.f32.mrb[0].mxu0 }
  0xe6   :  { %v173_v15 = vpop.f32.mrb[1].mxu0  ;;  %v182_v17 = vadd.f32 %v1661_v13, %v1570_v14 }
  0xe7   :  { %v1662_v16 = vpop.f32.mrb[2].mxu0  ;;  %v174_v20 = vadd.f32 %v1570_v14, %v173_v15 }
  0xe8   :  { %v185_v18 = vadd.f32 %v1662_v16, %v1570_v14  ;;  %v176_v19 = vpop.f32.mrb[3].mxu0 }
  0xe9   :  { %v177_v21 = vadd.f32 %v1570_v14, %v176_v19 }
  0xea   :  { %v1973_v22 = vpack.c.bf16 %v185_v18, %v182_v17 }
  0xeb   :  { %v236_v23 = vpack.c.bf16 %v177_v21, %v174_v20 }
  0xec   :  { %v304_v57 = vsel %vm249_vm2, %v1973_v22, 0 }
  0xed   :  { %v1665_v24 = vpop.f32.mrb[4].mxu0  ;;  %247 = vrot.lane.b32.xlu0 %v236_v23, %s1885_s1  ;;  %v254_v25 = vsel %vm249_vm2, %v236_v23, 0 }
  0xee   :  { %v189_v26 = vpop.f32.mrb[5].mxu0  ;;  %1676 = vmatpush3.bf16.xpose.msra.mxu1 %v254_v25  ;;  %v198_v28 = vadd.f32 %v1665_v24, %v1570_v14 }
  0xef   :  { %v1666_v27 = vpop.f32.mrb[6].mxu0  ;;  %1681 = vmatprep.subr.bf16.mxu1 %v1883_v12  ;;  %v190_v31 = vadd.f32 %v1570_v14, %v189_v26 }
  0xf0   :  { %v201_v29 = vadd.f32 %v1666_v27, %v1570_v14  ;;  %v192_v30 = vpop.f32.mrb[7].mxu0 }
  0xf1   :  { %v193_v32 = vadd.f32 %v1570_v14, %v192_v30  ;;  %298 = vrot.lane.b32.xlu0 %v1973_v22, %s1885_s1 }
  0xf2   :  { %v1980_v33 = vpack.c.bf16 %v201_v29, %v198_v28 }
  0xf3   :  { %v1982_v34 = vpack.c.bf16 %v193_v32, %v190_v31 }
  0xf4   :  { %v404_v63 = vsel %vm249_vm2, %v1980_v33, 0 }
  0xf5   :  { %v1669_v35 = vpop.f32.mrb[8].mxu0  ;;  %348 = vrot.lane.b32.xlu1 %v1982_v34, %s1885_s1  ;;  %v354_v60 = vsel %vm249_vm2, %v1982_v34, 0 }
  0xf6   :  { %v214_v36 = vadd.f32 %v1669_v35, %v1570_v14  ;;  %v205_v37 = vpop.f32.mrb[9].mxu0 }
  0xf7   :  { %v1670_v38 = vpop.f32.mrb[10].mxu0  ;;  %v206_v41 = vadd.f32 %v1570_v14, %v205_v37 }
  0xf8   :  { %v217_v39 = vadd.f32 %v1670_v38, %v1570_v14  ;;  %v208_v40 = vpop.f32.mrb[11].mxu0 }
  0xf9   :  { %v209_v42 = vadd.f32 %v1570_v14, %v208_v40  ;;  %398 = vrot.lane.b32.xlu1 %v1980_v33, %s1885_s1 }
  0xfa   :  { %v1988_v43 = vpack.c.bf16 %v217_v39, %v214_v36 }
  0xfb   :  { %v1990_v44 = vpack.c.bf16 %v209_v42, %v206_v41 }
  0xfc   :  { %v504_v45 = vsel %vm249_vm2, %v1988_v43, 0 }
  0xfd   :  { %v1673_v46 = vpop.f32.mrb[12].mxu0  ;;  %1706 = vmatpush3.bf16.xpose.msra.mxu0 %v504_v45  ;;  %498 = vrot.lane.b32.xlu1 %v1988_v43, %s1885_s1  ;;  %v454_v2 = vsel %vm249_vm2, %v1990_v44, 0 }
  0xfe   :  { %v230_v47 = vadd.f32 %v1673_v46, %v1570_v14  ;;  %448 = vrot.lane.b32.xlu0 %v1990_v44, %s1885_s1  ;;  %v221_v48 = vpop.f32.mrb[13].mxu0  ;;  %1717 = vmatprep.subr.bf16.mxu0 %v1883_v12 }
  0xff   :  { %v1674_v49 = vpop.f32.mrb[14].mxu0  ;;  %v222_v52 = vadd.f32 %v1570_v14, %v221_v48 }
 0x100   :  { %v233_v50 = vadd.f32 %v1674_v49, %v1570_v14  ;;  %v224_v51 = vpop.f32.mrb[15].mxu0 }
 0x101   :  { %v225_v53 = vadd.f32 %v1570_v14, %v224_v51 }
 0x102   :  { %v1999_v54 = vpack.c.bf16 %v233_v50, %v230_v47 }
 0x103   :  { %v2001_v55 = vpack.c.bf16 %v225_v53, %v222_v52 }
 0x104   :  { %598 = vrot.lane.b32.xlu1 %v1999_v54, %s1885_s1  ;;  %v604_v0 = vsel %vm249_vm2, %v1999_v54, 0 }
 0x105   :  { %548 = vrot.lane.b32.xlu0 %v2001_v55, %s1885_s1  ;;  %v554_v4 = vsel %vm249_vm2, %v2001_v55, 0 }
 0x108   :  { %831 = vrot.lane.b32.xlu1 %v236_v23, %s1886_s3 }
 0x15f   :  { %v248_v56 = vpop.permute.xlu0 %247 }
 0x160   :  { %1678 = vmatmul.mubr.msk.bf16.vlgmr.msra.gmra.mrb[0].mxu1 %vm249_vm2, %v248_v56 }
 0x161   :  { %1682 = vmatpush3.bf16.xpose.msra.mxu1 %v304_v57  ;;  %1683 = vmatprep.mubr.msk.bf16.mxu1 %vm1884_vm1, %v1883_v12 }
 0x162   :  { %1687 = vmatprep.subr.bf16.mxu1 %v1883_v12 }
 0x163   :  { %v299_v58 = vpop.permute.xlu0 %298 }
 0x167   :  { %v349_v59 = vpop.permute.xlu1 %348 }
 0x168   :  { %1684 = vmatmul.mubr.msk.bf16.vlgmr.msra.gmra.mrb[4].mxu1 %vm249_vm2, %v299_v58 }
 0x169   :  { %1688 = vmatpush3.bf16.xpose.msra.mxu1 %v354_v60  ;;  %1689 = vmatprep.mubr.msk.bf16.mxu1 %vm1884_vm1, %v1883_v12 }
 0x16a   :  { %1693 = vmatprep.subr.bf16.mxu1 %v1883_v12 }
 0x16b   :  { %v399_v61 = vpop.permute.xlu1 %398 }
 0x16f   :  { %v499_v62 = vpop.permute.xlu1 %498 }
 0x170   :  { %1690 = vmatmul.mubr.msk.bf16.vlgmr.msra.gmra.mrb[8].mxu1 %vm249_vm2, %v349_v59  ;;  %1708 = vmatmul.mubr.msk.bf16.vlgmr.msra.gmra.mrb[16].mxu0 %vm249_vm2, %v499_v62  ;;  %v449_v3 = vpop.permute.xlu0 %448 }
 0x171   :  { %1694 = vmatpush3.bf16.xpose.msra.mxu1 %v404_v63  ;;  %1718 = vmatpush3.bf16.xpose.msra.mxu0 %v604_v0 }
 0x172   :  { %1719 = vmatprep.mubr.msk.bf16.mxu0 %vm1884_vm1, %v1883_v12  ;;  %1695 = vmatprep.mubr.msk.bf16.mxu1 %vm1884_vm1, %v1883_v12 }
 0x173   :  { %1699 = vmatprep.subr.bf16.mxu1 %v1883_v12  ;;  %1729 = vmatprep.subr.bf16.mxu0 %v1883_v12 }
 0x176   :  { %v599_v1 = vpop.permute.xlu1 %598 }
 0x177   :  { %v549_v5 = vpop.permute.xlu0 %548 }
 0x178   :  { %1696 = vmatmul.mubr.msk.bf16.vlgmr.msra.gmra.mrb[12].mxu1 %vm249_vm2, %v399_v61  ;;  %1720 = vmatmul.mubr.msk.bf16.vlgmr.msra.gmra.mrb[20].mxu0 %vm249_vm2, %v599_v1 }
 0x179   :  { %1700 = vmatpush3.bf16.xpose.msra.mxu1 %v454_v2  ;;  %1701 = vmatprep.mubr.msk.bf16.mxu1 %vm1884_vm1, %v1883_v12 }
 0x17a   :  { %1711 = vmatprep.subr.bf16.mxu1 %v1883_v12  ;;  %1731 = vmatprep.mubr.msk.bf16.mxu0 %vm1884_vm1, %v1883_v12  ;;  %v832_v6 = vpop.permute.xlu1 %831 }
 0x180   :  { %1702 = vmatmul.mubr.msk.bf16.vlgmr.msra.gmra.mrb[16].mxu1 %vm249_vm2, %v449_v3 }
 0x181   :  { %1712 = vmatpush3.bf16.xpose.msra.mxu1 %v554_v4  ;;  %1713 = vmatprep.mubr.msk.bf16.mxu1 %vm1884_vm1, %v1883_v12 }
 0x182   :  { %1723 = vmatprep.subr.bf16.mxu1 %v1883_v12 }
 0x188   :  { %1714 = vmatmul.mubr.msk.bf16.vlgmr.msra.gmra.mrb[20].mxu1 %vm249_vm2, %v549_v5 }
 0x189   :  { %1724 = vmatpush3.bf16.msra.mxu1 %v832_v6  ;;  %1725 = vmatprep.mubr.msk.bf16.mxu1 %vm1884_vm1, %v1883_v12 }
 0x18a   :  { %1735 = vmatprep.subr.bf16.mxu1 %v1883_v12 }
 0x233   :  { %v290_v8 = vpop.f32.mrb[0].mxu1 }
 0x234   :  { %v2062_v10 = vadd.f32 %v290_v8, %v2054_v7  ;;  %v1679_v11 = vpop.f32.mrb[1].mxu1 }
 0x235   :  { %v293_v13 = vpop.f32.mrb[2].mxu1 }
 0x236   :  { %v2065_v14 = vadd.f32 %v293_v13, %v2059_v9  ;;  %v1680_v15 = vpop.f32.mrb[3].mxu1  ;;  %v647_v16 = vsel %vm249_vm2, %v2062_v10, -inf }
 0x237   :  { %648 = vmax.xlane.f32.xlu0 %v647_v16 }
 0x238   :  { %v650_v17 = vsel %vm249_vm2, %v2065_v14, -inf }
 0x239   :  { %651 = vmax.xlane.f32.xlu1 %v650_v17 }
 0x23b   :  { %v340_v18 = vpop.f32.mrb[4].mxu1 }
 0x23c   :  { %v2072_v19 = vadd.f32 %v340_v18, %v2054_v7  ;;  %v1685_v20 = vpop.f32.mrb[5].mxu1 }
 0x23d   :  { %v343_v21 = vpop.f32.mrb[6].mxu1 }
 0x23e   :  { %v2075_v23 = vadd.f32 %v343_v21, %v2059_v9  ;;  %v1686_v24 = vpop.f32.mrb[7].mxu1  ;;  %v653_v25 = vsel %vm249_vm2, %v2072_v19, -inf }
 0x23f   :  { %654 = vmax.xlane.f32.xlu0 %v653_v25 }
 0x240   :  { %v656_v26 = vsel %vm249_vm2, %v2075_v23, -inf }
 0x243   :  { %v540_v27 = vpop.f32.mrb[16].mxu0  ;;  %657 = vmax.xlane.f32.xlu0 %v656_v26  ;;  %v390_v28 = vpop.f32.mrb[8].mxu1 }
 0x244   :  { %v2082_v29 = vadd.f32 %v540_v27, %v2054_v7  ;;  %v1691_v30 = vpop.f32.mrb[9].mxu1  ;;  %v1709_v31 = vpop.f32.mrb[17].mxu0  ;;  %v2085_v36 = vadd.f32 %v390_v28, %v2054_v7 }
 0x245   :  { %v393_v32 = vpop.f32.mrb[10].mxu1  ;;  %v543_v35 = vpop.f32.mrb[18].mxu0 }
 0x246   :  { %v2088_v37 = vadd.f32 %v543_v35, %v2059_v9  ;;  %v1692_v38 = vpop.f32.mrb[11].mxu1  ;;  %v1710_v39 = vpop.f32.mrb[19].mxu0  ;;  %v677_v40 = vsel %vm249_vm2, %v2082_v29, -inf  ;;  %v2093_v41 = vadd.f32 %v393_v32, %v2059_v9  ;;  %v659_v45 = vsel %vm249_vm2, %v2085_v36, -inf }
 0x247   :  { %678 = vmax.xlane.f32.xlu1 %v677_v40 }
 0x248   :  { %v680_v42 = vsel %vm249_vm2, %v2088_v37, -inf  ;;  %v662_v51 = vsel %vm249_vm2, %v2093_v41, -inf }
 0x249   :  { %681 = vmax.xlane.f32.xlu0 %v680_v42 }
 0x24b   :  { %v640_v46 = vpop.f32.mrb[20].mxu0  ;;  %660 = vmax.xlane.f32.xlu1 %v659_v45  ;;  %v440_v47 = vpop.f32.mrb[12].mxu1 }
 0x24c   :  { %v2100_v48 = vadd.f32 %v640_v46, %v2054_v7  ;;  %v1697_v49 = vpop.f32.mrb[13].mxu1  ;;  %v1721_v50 = vpop.f32.mrb[21].mxu0  ;;  %v2105_v56 = vadd.f32 %v440_v47, %v2054_v7 }
 0x24d   :  { %v643_v52 = vpop.f32.mrb[22].mxu0  ;;  %663 = vmax.xlane.f32.xlu0 %v662_v51  ;;  %v443_v53 = vpop.f32.mrb[14].mxu1 }
 0x24e   :  { %v2108_v57 = vadd.f32 %v643_v52, %v2059_v9  ;;  %v1698_v58 = vpop.f32.mrb[15].mxu1  ;;  %v1722_v59 = vpop.f32.mrb[23].mxu0  ;;  %v689_v60 = vsel %vm249_vm2, %v2100_v48, -inf  ;;  %v2113_v61 = vadd.f32 %v443_v53, %v2059_v9  ;;  %v665_v63 = vsel %vm249_vm2, %v2105_v56, -inf }
 0x24f   :  { %690 = vmax.xlane.f32.xlu1 %v689_v60 }
 0x250   :  { %v692_v62 = vsel %vm249_vm2, %v2108_v57, -inf  ;;  %v668_v3 = vsel %vm249_vm2, %v2113_v61, -inf }
 0x251   :  { %693 = vmax.xlane.f32.xlu0 %v692_v62 }
 0x253   :  { %666 = vmax.xlane.f32.xlu1 %v665_v63  ;;  %v490_v0 = vpop.f32.mrb[16].mxu1 }
 0x254   :  { %v2120_v1 = vadd.f32 %v490_v0, %v2054_v7  ;;  %v1703_v2 = vpop.f32.mrb[17].mxu1 }
 0x255   :  { %669 = vmax.xlane.f32.xlu0 %v668_v3  ;;  %v493_v4 = vpop.f32.mrb[18].mxu1 }
 0x256   :  { %v2125_v5 = vadd.f32 %v493_v4, %v2059_v9  ;;  %v1704_v6 = vpop.f32.mrb[19].mxu1  ;;  %v671_v8 = vsel %vm249_vm2, %v2120_v1, -inf }
 0x257   :  { %672 = vmax.xlane.f32.xlu1 %v671_v8 }
 0x258   :  { %v674_v11 = vsel %vm249_vm2, %v2125_v5, -inf }
 0x259   :  { %675 = vmax.xlane.f32.xlu0 %v674_v11 }
 0x25b   :  { %v590_v13 = vpop.f32.mrb[20].mxu1 }
 0x25c   :  { %v2132_v15 = vadd.f32 %v590_v13, %v2054_v7  ;;  %v1715_v16 = vpop.f32.mrb[21].mxu1 }
 0x25d   :  { %v593_v17 = vpop.f32.mrb[22].mxu1 }
 0x25e   :  { %v2135_v18 = vadd.f32 %v593_v17, %v2059_v9  ;;  %v1716_v20 = vpop.f32.mrb[23].mxu1  ;;  %v683_v21 = vsel %vm249_vm2, %v2132_v15, -inf }
 0x25f   :  { %684 = vmax.xlane.f32.xlu1 %v683_v21 }
 0x260   :  { %v686_v24 = vsel %vm249_vm2, %v2135_v18, -inf }
 0x261   :  { %687 = vmax.xlane.f32.xlu0 %v686_v24 }
 0x270   :  { %925 = vrot.lane.b32.xlu1 %v1982_v34, %s1886_s3 }
 0x274   :  { %972 = vrot.lane.b32.xlu1 %v1980_v33, %s1886_s3 }
 0x277   :  { %878 = vrot.lane.b32.xlu0 %v1973_v22, %s1886_s3 }
 0x2c4   :  { %v649_v7 = vpop.xlane.xlu0 %648 }
 0x2c5   :  { %v695_v9 = vsub.f32 %v2062_v10, %v649_v7 }
 0x2c6   :  { %v652_v25 = vpop.xlane.xlu1 %651 }
 0x2c7   :  { %v711_v26 = vmul.f32 1.442695, %v695_v9  ;;  %v696_v27 = vsub.f32 %v2065_v14, %v652_v25 }
 0x2c9   :  { %1795 = vpow2.f32 %v711_v26  ;;  %v713_v28 = vmul.f32 1.442695, %v696_v27 }
 0x2cb   :  { %1797 = vpow2.f32 %v713_v28 }
 0x2cc   :  { %v655_v30 = vpop.xlane.xlu0 %654 }
 0x2cd   :  { %v697_v31 = vsub.f32 %v2072_v19, %v655_v30 }
 0x2cf   :  { %v715_v34 = vmul.f32 1.442695, %v697_v31 }
 0x2d0   :  { %v658_v32 = vpop.xlane.xlu0 %657 }
 0x2d1   :  { %1799 = vpow2.f32 %v715_v34  ;;  %v698_v33 = vsub.f32 %v2075_v23, %v658_v32 }
 0x2d3   :  { %v2151_v35 = vpop.eup %1795  ;;  %v717_v22 = vmul.f32 1.442695, %v698_v33 }
 0x2d4   :  { %v679_v38 = vpop.xlane.xlu1 %678  ;;  %v743_v10 = vsel %vm249_vm2, %v2151_v35, 0.0 }
 0x2d5   :  { %v2155_v39 = vpop.eup %1797  ;;  %1801 = vpow2.f32 %v717_v22  ;;  %v705_v14 = vsub.f32 %v2082_v29, %v679_v38  ;;  %744 = vadd.xlane.f32.xlu1 %v743_v10 }
 0x2d6   :  { %v682_v40 = vpop.xlane.xlu0 %681  ;;  %v746_v19 = vsel %vm249_vm2, %v2155_v39, 0.0 }
 0x2d7   :  { %v731_v42 = vmul.f32 1.442695, %v705_v14  ;;  %v706_v23 = vsub.f32 %v2088_v37, %v682_v40  ;;  %747 = vadd.xlane.f32.xlu0 %v746_v19 }
 0x2d8   :  { %v661_v45 = vpop.xlane.xlu1 %660 }
 0x2d9   :  { %1803 = vpow2.f32 %v731_v42  ;;  %v733_v46 = vmul.f32 1.442695, %v706_v23  ;;  %v699_v47 = vsub.f32 %v2085_v36, %v661_v45 }
 0x2da   :  { %v664_v49 = vpop.xlane.xlu0 %663 }
 0x2db   :  { %v2162_v50 = vpop.eup %1799  ;;  %1805 = vpow2.f32 %v733_v46  ;;  %v719_v51 = vmul.f32 1.442695, %v699_v47  ;;  %v700_v29 = vsub.f32 %v2093_v41, %v664_v49 }
 0x2dc   :  { %v691_v52 = vpop.xlane.xlu1 %690  ;;  %v749_v53 = vsel %vm249_vm2, %v2162_v50, 0.0 }
 0x2dd   :  { %1807 = vpow2.f32 %v719_v51  ;;  %v721_v58 = vmul.f32 1.442695, %v700_v29  ;;  %v709_v37 = vsub.f32 %v2100_v48, %v691_v52  ;;  %750 = vadd.xlane.f32.xlu1 %v749_v53 }
 0x2de   :  { %v694_v59 = vpop.xlane.xlu0 %693 }
 0x2df   :  { %v2168_v60 = vpop.eup %1801  ;;  %1809 = vpow2.f32 %v721_v58  ;;  %v739_v36 = vmul.f32 1.442695, %v709_v37  ;;  %v710_v62 = vsub.f32 %v2108_v57, %v694_v59 }
 0x2e0   :  { %v667_v63 = vpop.xlane.xlu1 %666  ;;  %v752_v41 = vsel %vm249_vm2, %v2168_v60, 0.0 }
 0x2e1   :  { %1811 = vpow2.f32 %v739_v36  ;;  %v741_v0 = vmul.f32 1.442695, %v710_v62  ;;  %v701_v2 = vsub.f32 %v2105_v56, %v667_v63  ;;  %753 = vadd.xlane.f32.xlu0 %v752_v41 }
 0x2e2   :  { %v670_v3 = vpop.xlane.xlu0 %669 }
 0x2e3   :  { %v2174_v4 = vpop.eup %1803  ;;  %1813 = vpow2.f32 %v741_v0  ;;  %v723_v48 = vmul.f32 1.442695, %v701_v2  ;;  %v702_v6 = vsub.f32 %v2113_v61, %v670_v3 }
 0x2e4   :  { %v773_v8 = vsel %vm249_vm2, %v2174_v4, 0.0  ;;  %v673_v34 = vpop.xlane.xlu1 %672 }
 0x2e5   :  { %v2179_v57 = vpop.eup %1805  ;;  %1815 = vpow2.f32 %v723_v48  ;;  %v725_v11 = vmul.f32 1.442695, %v702_v6  ;;  %774 = vadd.xlane.f32.xlu1 %v773_v8  ;;  %v703_v32 = vsub.f32 %v2120_v1, %v673_v34 }
 0x2e6   :  { %v776_v13 = vsel %vm249_vm2, %v2179_v57, 0.0  ;;  %v676_v61 = vpop.xlane.xlu0 %675 }
 0x2e7   :  { %v2183_v56 = vpop.eup %1807  ;;  %1817 = vpow2.f32 %v725_v11  ;;  %777 = vadd.xlane.f32.xlu0 %v776_v13  ;;  %v704_v22 = vsub.f32 %v2125_v5, %v676_v61  ;;  %v727_v38 = vmul.f32 1.442695, %v703_v32 }
 0x2e8   :  { %v755_v16 = vsel %vm249_vm2, %v2183_v56, 0.0 }
 0x2e9   :  { %v2187_v17 = vpop.eup %1809  ;;  %756 = vadd.xlane.f32.xlu1 %v755_v16  ;;  %v729_v14 = vmul.f32 1.442695, %v704_v22  ;;  %1819 = vpow2.f32 %v727_v38 }
 0x2ea   :  { %v758_v20 = vsel %vm249_vm2, %v2187_v17, 0.0 }
 0x2eb   :  { %v2191_v21 = vpop.eup %1811  ;;  %759 = vadd.xlane.f32.xlu0 %v758_v20  ;;  %1821 = vpow2.f32 %v729_v14 }
 0x2ec   :  { %v785_v24 = vsel %vm249_vm2, %v2191_v21, 0.0  ;;  %v685_v33 = vpop.xlane.xlu1 %684 }
 0x2ed   :  { %v2195_v7 = vpop.eup %1813  ;;  %786 = vadd.xlane.f32.xlu1 %v785_v24  ;;  %v707_v10 = vsub.f32 %v2132_v15, %v685_v33 }
 0x2ee   :  { %v688_v9 = vpop.xlane.xlu0 %687  ;;  %v788_v25 = vsel %vm249_vm2, %v2195_v7, 0.0 }
 0x2ef   :  { %v2199_v26 = vpop.eup %1815  ;;  %789 = vadd.xlane.f32.xlu0 %v788_v25  ;;  %v708_v40 = vsub.f32 %v2135_v18, %v688_v9  ;;  %v735_v19 = vmul.f32 1.442695, %v707_v10 }
 0x2f0   :  { %v761_v27 = vsel %vm249_vm2, %v2199_v26, 0.0  ;;  %v926_v46 = vpop.permute.xlu1 %925 }
 0x2f1   :  { %v2203_v28 = vpop.eup %1817  ;;  %762 = vadd.xlane.f32.xlu1 %v761_v27  ;;  %v737_v42 = vmul.f32 1.442695, %v708_v40  ;;  %1823 = vpow2.f32 %v735_v19 }
 0x2f2   :  { %v879_v30 = vpop.permute.xlu0 %878  ;;  %v764_v31 = vsel %vm249_vm2, %v2203_v28, 0.0 }
 0x2f3   :  { %765 = vadd.xlane.f32.xlu0 %v764_v31  ;;  %1730 = vmatpush3.bf16.msra.mxu0 %v879_v30  ;;  %1825 = vpow2.f32 %v737_v42 }
 0x2f4   :  { %1741 = vmatprep.subr.bf16.mxu0 %v1883_v12  ;;  %v973_v47 = vpop.permute.xlu1 %972 }
 0x302   :  { %1066 = vrot.lane.b32.xlu1 %v1988_v43, %s1886_s3  ;;  %v2216_v43 = vpop.eup %1819 }
 0x303   :  { %v767_v1 = vsel %vm249_vm2, %v2216_v43, 0.0 }
 0x309   :  { %1019 = vrot.lane.b32.xlu0 %v1990_v44, %s1886_s3  ;;  %v2218_v44 = vpop.eup %1821 }
 0x30a   :  { %v2222_v5 = vpop.eup %1823  ;;  %v770_v15 = vsel %vm249_vm2, %v2218_v44, 0.0 }
 0x30b   :  { %v2226_v18 = vpop.eup %1825  ;;  %v779_v23 = vsel %vm249_vm2, %v2222_v5, 0.0 }
 0x30c   :  { %v782_v45 = vsel %vm249_vm2, %v2226_v18, 0.0 }
 0x326   :  { %768 = vadd.xlane.f32.xlu1 %v767_v1 }
 0x328   :  { %771 = vadd.xlane.f32.xlu0 %v770_v15 }
 0x32a   :  { %780 = vadd.xlane.f32.xlu1 %v779_v23 }
 0x32c   :  { %783 = vadd.xlane.f32.xlu0 %v782_v45 }
 0x33b   :  { %1160 = vrot.lane.b32.xlu1 %v1999_v54, %s1886_s3 }
 0x342   :  { %1113 = vrot.lane.b32.xlu0 %v2001_v55, %s1886_s3 }
 0x362   :  { %v745_v49 = vpop.xlane.xlu1 %744 }
 0x363   :  { %1827 = vrcp.f32 %v745_v49 }
 0x364   :  { %v748_v51 = vpop.xlane.xlu0 %747 }
 0x365   :  { %1829 = vrcp.f32 %v748_v51 }
 0x36a   :  { %v751_v29 = vpop.xlane.xlu1 %750 }
 0x36b   :  { %1831 = vrcp.f32 %v751_v29 }
 0x36d   :  { %v1828_v52 = vpop.eup %1827 }
 0x36e   :  { %v754_v53 = vpop.xlane.xlu0 %753  ;;  %v807_v37 = vmul.f32 %v1828_v52, %v2151_v35 }
 0x36f   :  { %v1830_v58 = vpop.eup %1829  ;;  %1833 = vrcp.f32 %v754_v53 }
 0x370   :  { %v808_v59 = vmul.f32 %v1830_v58, %v2155_v39 }
 0x372   :  { %v775_v54 = vpop.xlane.xlu1 %774  ;;  %v823_v36 = vpack.c.bf16 %v808_v59, %v807_v37  ;;  %v1887_v59 = vmov 1983009808  }
 0x374   :  { %1726 = vmatmul.mubr.msk.bf16.vlgmr.msra.gmra.mrb[24].mxu1 %vm249_vm2, %v823_v36  ;;  %v778_v55 = vpop.xlane.xlu0 %777  ;;  %v1212_v36 = vlaneseq }
 0x375   :  { %1736 = vmatpush3.bf16.msra.mxu1 %v926_v46  ;;  %1737 = vmatprep.mubr.msk.bf16.mxu1 %vm1884_vm1, %v1883_v12  ;;  %v1832_v63 = vpop.eup %1831 }
 0x376   :  { %v757_v62 = vpop.xlane.xlu1 %756  ;;  %1747 = vmatprep.subr.bf16.mxu1 %v1883_v12  ;;  %v809_v35 = vmul.f32 %v1832_v63, %v2162_v50 }
 0x377   :  { %1835 = vrcp.f32 %v757_v62 }
 0x378   :  { %v760_v41 = vpop.xlane.xlu0 %759 }
 0x379   :  { %v1834_v0 = vpop.eup %1833  ;;  %1837 = vrcp.f32 %v760_v41 }
 0x37a   :  { %v810_v39 = vmul.f32 %v1834_v0, %v2168_v60  ;;  %v787_v2 = vpop.xlane.xlu1 %786 }
 0x37c   :  { %v790_v3 = vpop.xlane.xlu0 %789  ;;  %v824_v48 = vpack.c.bf16 %v810_v39, %v809_v35 }
 0x37e   :  { %v763_v6 = vpop.xlane.xlu1 %762  ;;  %1732 = vmatmul.mubr.msk.bf16.vlgmr.msra.gmra.mrb[24].mxu0 %vm249_vm2, %v824_v48 }
 0x37f   :  { %1839 = vrcp.f32 %v763_v6  ;;  %1742 = vmatpush3.bf16.msra.mxu0 %v973_v47  ;;  %1743 = vmatprep.mubr.msk.bf16.mxu0 %vm1884_vm1, %v1883_v12 }
 0x380   :  { %v766_v8 = vpop.xlane.xlu0 %765  ;;  %1753 = vmatprep.subr.bf16.mxu0 %v1883_v12 }
 0x381   :  { %v1836_v11 = vpop.eup %1835  ;;  %1841 = vrcp.f32 %v766_v8 }
 0x382   :  { %v811_v50 = vmul.f32 %v1836_v11, %v2183_v56  ;;  %1843 = vrcp.f32 %v778_v55  ;;  %v1067_v27 = vpop.permute.xlu1 %1066 }
 0x383   :  { %v1838_v13 = vpop.eup %1837  ;;  %1845 = vrcp.f32 %v775_v54  ;;  %v1210_v54 = vunpack.c.l.s4 %v1887_v59 }
 0x384   :  { %v812_v60 = vmul.f32 %v1838_v13, %v2187_v17  ;;  %v1020_v61 = vpop.permute.xlu0 %1019  ;;  %1847 = vrcp.f32 %v790_v3 }
 0x385   :  { %1849 = vrcp.f32 %v787_v2  ;;  %v1211_v63 = vunpack.c.0.s8 %v1210_v54 }
 0x386   :  { %v825_v16 = vpack.c.bf16 %v812_v60, %v811_v50 }
 0x388   :  { %1738 = vmatmul.mubr.msk.bf16.vlgmr.msra.gmra.mrb[28].mxu1 %vm249_vm2, %v825_v16 }
 0x389   :  { %v1840_v20 = vpop.eup %1839  ;;  %1748 = vmatpush3.bf16.msra.mxu1 %v1020_v61  ;;  %1749 = vmatprep.mubr.msk.bf16.mxu1 %vm1884_vm1, %v1883_v12 }
 0x38a   :  { %1759 = vmatprep.subr.bf16.mxu1 %v1883_v12  ;;  %v813_v9 = vmul.f32 %v1840_v20, %v2199_v26 }
 0x38b   :  { %v1842_v24 = vpop.eup %1841 }
 0x38c   :  { %v814_v56 = vmul.f32 %v1842_v24, %v2203_v28  ;;  %v1844_v17 = vpop.eup %1843 }
 0x38d   :  { %v1846_v30 = vpop.eup %1845  ;;  %v818_v31 = vmul.f32 %v1844_v17, %v2179_v57 }
 0x38e   :  { %v826_v25 = vpack.c.bf16 %v814_v56, %v813_v9  ;;  %v817_v34 = vmul.f32 %v1846_v30, %v2174_v4  ;;  %v1848_v33 = vpop.eup %1847 }
 0x38f   :  { %v1850_v38 = vpop.eup %1849  ;;  %v822_v57 = vmul.f32 %v1848_v33, %v2195_v7 }
 0x390   :  { %1744 = vmatmul.mubr.msk.bf16.vlgmr.msra.gmra.mrb[28].mxu0 %vm249_vm2, %v826_v25  ;;  %v828_v32 = vpack.c.bf16 %v818_v31, %v817_v34  ;;  %v821_v4 = vmul.f32 %v1850_v38, %v2191_v21 }
 0x391   :  { %1754 = vmatpush3.bf16.msra.mxu0 %v1067_v27  ;;  %1755 = vmatprep.mubr.msk.bf16.mxu0 %vm1884_vm1, %v1883_v12 }
 0x392   :  { %1765 = vmatprep.subr.bf16.mxu0 %v1883_v12  ;;  %v830_v40 = vpack.c.bf16 %v822_v57, %v821_v4 }
 0x398   :  { %1756 = vmatmul.mubr.msk.bf16.vlgmr.msra.gmra.mrb[32].mxu0 %vm249_vm2, %v828_v32 }
 0x399   :  { %1767 = vmatprep.mubr.msk.bf16.mxu0 %vm1884_vm1, %v1883_v12 }
 0x3b3   :  { %v769_v26 = vpop.xlane.xlu1 %768 }
 0x3b4   :  { %1851 = vrcp.f32 %v769_v26 }
 0x3b5   :  { %v772_v28 = vpop.xlane.xlu0 %771 }
 0x3b6   :  { %1853 = vrcp.f32 %v772_v28 }
 0x3b7   :  { %v781_v22 = vpop.xlane.xlu1 %780 }
 0x3b9   :  { %v784_v10 = vpop.xlane.xlu0 %783 }
 0x3ba   :  { %1855 = vrcp.f32 %v784_v10 }
 0x3bb   :  { %v1161_v14 = vpop.permute.xlu1 %1160  ;;  %1857 = vrcp.f32 %v781_v22 }
 0x3bc   :  { %1766 = vmatpush3.bf16.msra.mxu0 %v1161_v14 }
 0x3bd   :  { %v1114_v46 = vpop.permute.xlu0 %1113 }
 0x3be   :  { %v1852_v19 = vpop.eup %1851 }
 0x3bf   :  { %1768 = vmatmul.mubr.msk.bf16.vlgmr.msra.gmra.mrb[36].mxu0 %vm249_vm2, %v830_v40  ;;  %v815_v1 = vmul.f32 %v1852_v19, %v2216_v43 }
 0x3c0   :  { %v1854_v42 = vpop.eup %1853 }
 0x3c1   :  { %v816_v15 = vmul.f32 %v1854_v42, %v2218_v44 }
 0x3c3   :  { %v827_v23 = vpack.c.bf16 %v816_v15, %v815_v1 }
 0x3c4   :  { %v1856_v45 = vpop.eup %1855 }
 0x3c5   :  { %1750 = vmatmul.mubr.msk.bf16.vlgmr.msra.gmra.mrb[32].mxu1 %vm249_vm2, %v827_v23  ;;  %v1858_v7 = vpop.eup %1857  ;;  %v820_v21 = vmul.f32 %v1856_v45, %v2226_v18  ;;  %v1888_v45 = vmov 1934713408  }
 0x3c6   :  { %1760 = vmatpush3.bf16.msra.mxu1 %v1114_v46  ;;  %1761 = vmatprep.mubr.msk.bf16.mxu1 %vm1884_vm1, %v1883_v12  ;;  %v819_v47 = vmul.f32 %v1858_v7, %v2222_v5  ;;  %v1213_v5 = vshrl.u32 %v1212_v36, 7  ;;  %v1274_v46 = vunpack.c.l.s4 %v1888_v45 }
 0x3c8   :  { %v829_v49 = vpack.c.bf16 %v820_v21, %v819_v47  ;;  %v2276_v2 = vsub.s32 %v1211_v63, %v1213_v5  ;;  %v1275_v47 = vunpack.c.0.s8 %v1274_v46 }
 0x3cd   :  { %1762 = vmatmul.mubr.msk.bf16.vlgmr.msra.gmra.mrb[36].mxu1 %vm249_vm2, %v829_v49 }
 0x447   :  { %v871_v43 = vpop.f32.mrb[24].mxu1 }
 0x448   :  { %v1727_v51 = vpop.f32.mrb[25].mxu1 }
 0x449   :  { %v874_v44 = vpop.f32.mrb[26].mxu1  ;;  %v1278_v51 = vsub.s32 %v1275_v47, %v1213_v5 }
 0x44a   :  { %v1728_v29 = vpop.f32.mrb[27].mxu1 }
 0x451   :  { %v918_v52 = vpop.f32.mrb[24].mxu0 }
 0x452   :  { %v1733_v53 = vpop.f32.mrb[25].mxu0 }
 0x453   :  { %v921_v58 = vpop.f32.mrb[26].mxu0 }
 0x454   :  { %v1734_v37 = vpop.f32.mrb[27].mxu0 }
 0x45b   :  { %v965_v55 = vpop.f32.mrb[28].mxu1 }
 0x45c   :  { %v1207_v12 = vcombine.low %v871_v43, %v965_v55  ;;  %v1208_v62 = vcombine.high %v871_v43, %v965_v55  ;;  %v1739_v18 = vpop.f32.mrb[29].mxu1 }
 0x45d   :  { %v968_v41 = vpop.f32.mrb[30].mxu1 }
 0x45e   :  { %v1343_v0 = vcombine.low %v874_v44, %v968_v41  ;;  %v1344_v35 = vcombine.high %v874_v44, %v968_v41  ;;  %v1740_v39 = vpop.f32.mrb[31].mxu1  ;;  %v1215_v11 = vrot.slane %v1207_v12, %v2276_v2  ;;  %v1222_v13 = vrot.slane %v1208_v62, %v2276_v2 }
 0x460   :  { %v1351_v27 = vrot.slane %v1343_v0, %v2276_v2  ;;  %v1358_v30 = vrot.slane %v1344_v35, %v2276_v2 }
 0x463   :  { %v1012_v3 = vpop.f32.mrb[28].mxu0 }
 0x464   :  { %v1223_v48 = vcombine.low %v918_v52, %v1012_v3  ;;  %v1224_v6 = vcombine.high %v918_v52, %v1012_v3  ;;  %v1745_v8 = vpop.f32.mrb[29].mxu0 }
 0x465   :  { %v1015_v50 = vpop.f32.mrb[30].mxu0 }
 0x466   :  { %v1231_v60 = vrot.slane %v1223_v48, %v2276_v2  ;;  %v1238_v16 = vrot.slane %v1224_v6, %v2276_v2  ;;  %v1359_v61 = vcombine.low %v921_v58, %v1015_v50  ;;  %v1360_v20 = vcombine.high %v921_v58, %v1015_v50  ;;  %v1746_v24 = vpop.f32.mrb[31].mxu0 }
 0x468   :  { %v1271_v9 = vcombine.low %v1215_v11, %v1231_v60  ;;  %v1272_v56 = vcombine.high %v1215_v11, %v1231_v60  ;;  %v1287_v25 = vcombine.low %v1222_v13, %v1238_v16  ;;  %v1288_v17 = vcombine.high %v1222_v13, %v1238_v16 }
 0x469   :  { %v1367_v31 = vrot.slane %v1359_v61, %v2276_v2  ;;  %v1374_v34 = vrot.slane %v1360_v20, %v2276_v2 }
 0x46a   :  { %v2286_v58 = vrot.slane %v1271_v9, %v1278_v51  ;;  %v1286_v37 = vrot.slane %v1272_v56, %v1278_v51  ;;  %v1295_v55 = vrot.slane %v1287_v25, %v1278_v51  ;;  %v2290_v12 = vrot.slane %v1288_v17, %v1278_v51 }
 0x46b   :  { %v1407_v32 = vcombine.low %v1351_v27, %v1367_v31  ;;  %v1408_v26 = vcombine.high %v1351_v27, %v1367_v31  ;;  %v1423_v28 = vcombine.low %v1358_v30, %v1374_v34  ;;  %v1424_v33 = vcombine.high %v1358_v30, %v1374_v34  ;;  %v1106_v22 = vpop.f32.mrb[32].mxu0 }
 0x46c   :  { %v1757_v38 = vpop.f32.mrb[33].mxu0 }
 0x46d   :  { %v1109_v57 = vpop.f32.mrb[34].mxu0  ;;  %v2294_v0 = vrot.slane %v1407_v32, %v1278_v51  ;;  %v1422_v35 = vrot.slane %v1408_v26, %v1278_v51  ;;  %v1431_v39 = vrot.slane %v1423_v28, %v1278_v51  ;;  %v1438_v3 = vrot.slane %v1424_v33, %v1278_v51 }
 0x46e   :  { %v1758_v10 = vpop.f32.mrb[35].mxu0 }
 0x492   :  { %v1200_v4 = vpop.f32.mrb[36].mxu0 }
 0x493   :  { %v1255_v14 = vcombine.low %v1106_v22, %v1200_v4  ;;  %v1256_v40 = vcombine.high %v1106_v22, %v1200_v4  ;;  %v1769_v19 = vpop.f32.mrb[37].mxu0 }
 0x494   :  { %v1203_v42 = vpop.f32.mrb[38].mxu0 }
 0x495   :  { %v1391_v1 = vcombine.low %v1109_v57, %v1203_v42  ;;  %v1392_v15 = vcombine.high %v1109_v57, %v1203_v42  ;;  %v1770_v23 = vpop.f32.mrb[39].mxu0  ;;  %v1263_v59 = vrot.slane %v1255_v14, %v2276_v2  ;;  %v1270_v54 = vrot.slane %v1256_v40, %v2276_v2 }
 0x497   :  { %v1399_v13 = vrot.slane %v1391_v1, %v2276_v2  ;;  %v1406_v50 = vrot.slane %v1392_v15, %v2276_v2 }
 0x498   :  { %v1059_v7 = vpop.f32.mrb[32].mxu1 }
 0x499   :  { %v1751_v21 = vpop.f32.mrb[33].mxu1 }
 0x49a   :  { %v1062_v49 = vpop.f32.mrb[34].mxu1 }
 0x49b   :  { %v1752_v43 = vpop.f32.mrb[35].mxu1 }
 0x4a0   :  { %v1153_v44 = vpop.f32.mrb[36].mxu1 }
 0x4a1   :  { %v1239_v29 = vcombine.low %v1059_v7, %v1153_v44  ;;  %v1240_v52 = vcombine.high %v1059_v7, %v1153_v44  ;;  %v1763_v53 = vpop.f32.mrb[37].mxu1 }
 0x4a2   :  { %v1156_v36 = vpop.f32.mrb[38].mxu1 }
 0x4a3   :  { %v1247_v62 = vrot.slane %v1239_v29, %v2276_v2  ;;  %v1254_v18 = vrot.slane %v1240_v52, %v2276_v2  ;;  %v1375_v63 = vcombine.low %v1062_v49, %v1156_v36  ;;  %v1376_v5 = vcombine.high %v1062_v49, %v1156_v36  ;;  %v1764_v41 = vpop.f32.mrb[39].mxu1 }
 0x4a5   :  { %v1303_v48 = vcombine.low %v1247_v62, %v1263_v59  ;;  %v1304_v6 = vcombine.high %v1247_v62, %v1263_v59  ;;  %v1319_v8 = vcombine.low %v1254_v18, %v1270_v54  ;;  %v1320_v11 = vcombine.high %v1254_v18, %v1270_v54 }
 0x4a6   :  { %v1383_v60 = vrot.slane %v1375_v63, %v2276_v2  ;;  %v1390_v16 = vrot.slane %v1376_v5, %v2276_v2 }
 0x4a7   :  { %v1311_v61 = vrot.slane %v1303_v48, %v1278_v51  ;;  %v1318_v20 = vrot.slane %v1304_v6, %v1278_v51  ;;  %v1327_v24 = vrot.slane %v1319_v8, %v1278_v51  ;;  %v1334_v9 = vrot.slane %v1320_v11, %v1278_v51 }
 0x4a8   :  { %v1439_v56 = vcombine.low %v1383_v60, %v1399_v13  ;;  %v1440_v25 = vcombine.high %v1383_v60, %v1399_v13  ;;  %v1455_v17 = vcombine.low %v1390_v16, %v1406_v50  ;;  %v1456_v27 = vcombine.high %v1390_v16, %v1406_v50 }
 0x4a9   :  { %v1336_v30 = vcombine.high %v2286_v58, %v1311_v61  ;;  %v1337_v31 = vcombine.low %v1286_v37, %v1318_v20  ;;  %v1338_v34 = vcombine.high %v1286_v37, %v1318_v20  ;;  %v1339_v32 = vcombine.low %v1295_v55, %v1327_v24 }
 0x4aa   :  { %v1447_v26 = vrot.slane %v1439_v56, %v1278_v51  ;;  %v1454_v28 = vrot.slane %v1440_v25, %v1278_v51  ;;  %v1463_v33 = vrot.slane %v1455_v17, %v1278_v51  ;;  %v1340_v22 = vcombine.high %v1295_v55, %v1327_v24 }
 0x4ab   :  { %1480 = vrot.lane.b32.xlu0 %v1336_v30, %s1889_s0  ;;  %v1341_v2 = vcombine.low %v2290_v12, %v1334_v9  ;;  %v1470_v38 = vrot.slane %v1456_v27, %v1278_v51  ;;  %v1342_v57 = vcombine.high %v2290_v12, %v1334_v9  ;;  %v1335_v10 = vcombine.low %v2286_v58, %v1311_v61 }
 0x4ac   :  { %v1472_v4 = vcombine.high %v2294_v0, %v1447_v26  ;;  %v1473_v14 = vcombine.low %v1422_v35, %v1454_v28  ;;  %v1474_v40 = vcombine.high %v1422_v35, %v1454_v28  ;;  %v1475_v19 = vcombine.low %v1431_v39, %v1463_v33 }
 0x4ad   :  { %v1476_v42 = vcombine.high %v1431_v39, %v1463_v33  ;;  %v1477_v1 = vcombine.low %v1438_v3, %v1470_v38  ;;  %v1478_v15 = vcombine.high %v1438_v3, %v1470_v38  ;;  %v1471_v23 = vcombine.low %v2294_v0, %v1447_v26 }
 0x4ae   :  { %1508 = vrot.lane.b32.xlu1 %v1472_v4, %s1889_s0 }
 0x4af   :  { %1484 = vrot.lane.b32.xlu0 %v1337_v31, %s1890_s18 }
 0x4b2   :  { %1512 = vrot.lane.b32.xlu1 %v1473_v14, %s1890_s18 }
 0x4b3   :  { %1488 = vrot.lane.b32.xlu0 %v1338_v34, %s1891_s19 }
 0x4b6   :  { %1516 = vrot.lane.b32.xlu1 %v1474_v40, %s1891_s19 }
 0x4b7   :  { %1492 = vrot.lane.b32.xlu0 %v1339_v32, %s1892_s20 }
 0x4ba   :  { %1520 = vrot.lane.b32.xlu1 %v1475_v19, %s1892_s20 }
 0x4bb   :  { %1496 = vrot.lane.b32.xlu0 %v1340_v22, %s1893_s21 }
 0x4be   :  { %1524 = vrot.lane.b32.xlu1 %v1476_v42, %s1893_s21 }
 0x4bf   :  { %1500 = vrot.lane.b32.xlu0 %v1341_v2, %s1886_s3 }
 0x4c2   :  { %1528 = vrot.lane.b32.xlu1 %v1477_v1, %s1886_s3 }
 0x4c3   :  { %1504 = vrot.lane.b32.xlu0 %v1342_v57, %s1885_s1 }
 0x4c6   :  { %1532 = vrot.lane.b32.xlu1 %v1478_v15, %s1885_s1 }
 0x51d   :  { %v1481_v45 = vpop.permute.xlu0 %1480 }
 0x51e   :  { %v1535_v29 = vsel %vm249_vm2, %v1335_v10, %v1481_v45 }
 0x520   :  { %v1509_v46 = vpop.permute.xlu1 %1508 }
 0x521   :  { %v1485_v7 = vpop.permute.xlu0 %1484  ;;  %v1547_v59 = vsel %vm249_vm2, %v1471_v23, %v1509_v46 }
 0x522   :  { %v1537_v53 = vsel %vm1536_vm3, %v1535_v29, %v1485_v7 }
 0x524   :  { %v1513_v21 = vpop.permute.xlu1 %1512 }
 0x525   :  { %v1489_v47 = vpop.permute.xlu0 %1488  ;;  %v1548_v36 = vsel %vm1536_vm3, %v1547_v59, %v1513_v21 }
 0x526   :  { %v1539_v37 = vsel %vm1538_vm4, %v1537_v53, %v1489_v47 }
 0x528   :  { %v1517_v49 = vpop.permute.xlu1 %1516 }
 0x529   :  { %v1493_v43 = vpop.permute.xlu0 %1492  ;;  %v1549_v62 = vsel %vm1538_vm4, %v1548_v36, %v1517_v49 }
 0x52a   :  { %v1540_v54 = vsel %vm114_vm0, %v1539_v37, %v1493_v43 }
 0x52c   :  { %v1521_v51 = vpop.permute.xlu1 %1520 }
 0x52d   :  { %v1497_v44 = vpop.permute.xlu0 %1496  ;;  %v1550_v5 = vsel %vm114_vm0, %v1549_v62, %v1521_v51 }
 0x52e   :  { %v1542_v55 = vsel %vm1541_vm5, %v1540_v54, %v1497_v44 }
 0x530   :  { %v1525_v52 = vpop.permute.xlu1 %1524 }
 0x531   :  { %v1501_v58 = vpop.permute.xlu0 %1500  ;;  %v1551_v0 = vsel %vm1541_vm5, %v1550_v5, %v1525_v52 }
 0x532   :  { %v1544_v18 = vsel %vm1543_vm6, %v1542_v55, %v1501_v58 }
 0x534   :  { %v1529_v12 = vpop.permute.xlu1 %1528 }
 0x535   :  { %v1505_v63 = vpop.permute.xlu0 %1504  ;;  %v1552_v35 = vsel %vm1543_vm6, %v1551_v0, %v1529_v12 }
 0x536   :  { %v1546_v41 = vsel %vm1545_vm7, %v1544_v18, %v1505_v63 }
 0x537   :  { %1554 = vst [vmem:[#allocation2] sm:$0xff] %v1546_v41 }
 0x538   :  { %v1533_v39 = vpop.permute.xlu1 %1532 }
 0x539   :  { %v1553_v3 = vsel %vm1545_vm7, %v1552_v35, %v1533_v39 }
 0x53a   :  { %1555 = vst [vmem:[#allocation2 + $0x8] sm:$0xff] %v1553_v3 }
 0x53b   :  { %1870 = shalt.err (!%p1867_p4)
}
 0x53c   :  { %s1871_s27 = scalar_lea.hbm %s2336_s4, 256 }
 0x53d   :  { %p1872_p5 = scmp.ne.s32.totalorder %s2336_s4, %s1871_s27  ;;  %p1875_p6 = scmp.lt.u32.totalorder %s1871_s27, %s2336_s4 }
 0x53f   :  { %p1877_p7 = pnand %p1875_p6, %p1872_p5 }
 0x541   :  { %1880 = shalt.err (!%p1877_p7)
}
 0x542   :  { %1565 = dma.vmem_to_hbm [thread:$0]  %s1563_s23, 256, %s2336_s4, [#allocation3]  }
 0x543   :  { %1881 = dma.done.wait [#allocation3], 256  }
 0x544   :  { %1882 = vsyncadd [#allocation3], 4294967040 }
 0x545   :  { %1569 = vsyncpa [#allocation3], 1 }

</bundles_post_ra>
